<compile_context>
chip_gen: v5e
topology: v5e:2x2
jax: 0.10.0
libtpu: 0.0.40
codegen_flags: <defaults>
</compile_context>

<pallas_src>
import functools

import jax
import jax.numpy as jnp
from jax import lax
from jax.experimental import pallas as pl
from jax.experimental.pallas import tpu as pltpu


def _ce_label_smooth_kernel(x_ref, t_ref, out_ref, *, epsilon: float,
                            num_classes: int, batch: int, block_rows: int,
                            chunk: int, num_full_chunks: int, rem: int,
                            unroll: bool):
    """Per-tile kernel.

    x_ref  : (TM, K)  logits (native dtype; promoted to f32 per chunk)
    t_ref  : (TM, 1)  i32 class indices
    out_ref: (1, 1, 1) f32 partial sum of row losses for this tile
    """
    i = pl.program_id(0)
    tm = block_rows

    tgt = t_ref[...].astype(jnp.int32)                                   # (TM, 1)

    # Chunk-constant lane iota, hoisted out of the K loop.
    lane_ids = lax.broadcasted_iota(jnp.int32, (tm, chunk), 1)           # (TM, KC)

    def accumulate(carry, xc, base, ids):
        """Fused single pass over one (TM, kc) chunk: online max / exp-sum,
        running sum(x) and the iota-compare gather of x[target]."""
        m, s, r, g = carry
        xc = xc.astype(jnp.float32)
        cmax = jnp.max(xc, axis=1, keepdims=True)
        m_new = jnp.maximum(m, cmax)
        # Rescale the running exp-sum to the new max, then add this chunk's.
        s = s * jnp.exp(m - m_new) + jnp.sum(jnp.exp(xc - m_new), axis=1,
                                             keepdims=True)
        r = r + jnp.sum(xc, axis=1, keepdims=True)
        hit = ids == (tgt - base)                 # (TM, kc), broadcast along lanes
        g = g + jnp.sum(jnp.where(hit, xc, 0.0), axis=1, keepdims=True)
        return m_new, s, r, g

    carry = (jnp.full((tm, 1), -jnp.inf, jnp.float32),   # running max m
             jnp.zeros((tm, 1), jnp.float32),            # running sum exp(x - m)
             jnp.zeros((tm, 1), jnp.float32),            # running sum x
             jnp.zeros((tm, 1), jnp.float32))            # x[target]

    if num_full_chunks > 0:
        if unroll:
            # Few chunks: fully unrolled with static slices (LLO visibility).
            for c in range(num_full_chunks):
                xc = x_ref[:, c * chunk:(c + 1) * chunk]
                carry = accumulate(carry, xc, c * chunk, lane_ids)
        else:
            def body(c, carry):
                base = pl.multiple_of(c * chunk, chunk)
                xc = x_ref[:, pl.ds(base, chunk)]
                return accumulate(carry, xc, base, lane_ids)
            carry = lax.fori_loop(0, num_full_chunks, body, carry)

    if rem > 0:
        rem_ids = lax.broadcasted_iota(jnp.int32, (tm, rem), 1)
        xr = x_ref[:, num_full_chunks * chunk:]
        carry = accumulate(carry, xr, num_full_chunks * chunk, rem_ids)

    m, s, r, g = carry
    # loss_row = (m + log sum exp(x-m)) - (1-eps)*x[target] - (eps/K)*sum_k x_k
    row_loss = (m + jnp.log(s)) - (1.0 - epsilon) * g \
               - (epsilon / float(num_classes)) * r                       # (TM, 1)

    # TODO(synk): bf16-native max/sum first passes on v6e/v7x (keep f32 on v5e)
    # and an MXU ones-vector row_sum are further VALU-slot savings.

    if batch % block_rows == 0:
        # No padded rows anywhere: unconditional per-tile partial sum.
        out_ref[...] = jnp.sum(row_loss).reshape(1, 1, 1)
    else:
        last = pl.num_programs(0) - 1

        @pl.when(i != last)
        def _():
            out_ref[...] = jnp.sum(row_loss).reshape(1, 1, 1)

        @pl.when(i == last)
        def _():
            # Mask rows past the true batch size; garbage logits there may be
            # NaN/Inf, but where() replaces (not multiplies) them.
            row_ids = i * block_rows + lax.broadcasted_iota(
                jnp.int32, (tm, 1), 0)
            masked = jnp.where(row_ids < batch, row_loss, 0.0)
            out_ref[...] = jnp.sum(masked).reshape(1, 1, 1)


def _round_up(x: int, m: int) -> int:
    return ((x + m - 1) // m) * m


def _sublane_multiple(dtype) -> int:
    # Packed-row multiple per dtype: 8 (f32) / 16 (bf16) / 32 (int8, fp8).
    return {4: 8, 2: 16, 1: 32}.get(jnp.dtype(dtype).itemsize, 8)


def _vmem_budgets() -> tuple[int, int]:
    """Generation-specific (logits tile byte budget, vmem_limit_bytes)."""
    vmem_cap = 64 * 1024 * 1024
    try:
        vmem_cap = int(getattr(pltpu.get_tpu_info(), "vmem_capacity_bytes",
                               vmem_cap))
    except Exception:
        pass  # conservative default (v7x-sized VMEM)
    if vmem_cap >= 100 * 1024 * 1024:            # v5e / v6e: 128 MiB VMEM
        return 14 * 1024 * 1024, 64 * 1024 * 1024
    return 8 * 1024 * 1024, 40 * 1024 * 1024     # v7x: 64 MiB per TensorCore


def cross_entropy_label_smooth(inputs, targets, *, epsilon: float = 0.1):
    """inputs: (B, K) float logits (f32 or bf16); targets: (B,) int labels."""
    B, K = inputs.shape
    targets2d = targets.astype(jnp.int32).reshape(B, 1)
    itemsize = jnp.dtype(inputs.dtype).itemsize
    sub = _sublane_multiple(inputs.dtype)

    tile_budget, vmem_limit = _vmem_budgets()
    row_bytes = max(1, K * itemsize)
    tm_cap = max(sub, (tile_budget // row_bytes) // sub * sub)

    if B > tm_cap:
        tm = tm_cap
    else:
        # Prefer >= 2 tiles when the batch allows it so v7x's second TensorCore
        # has work; degrades to a single tile for tiny batches.
        tm = min(_round_up(pl.cdiv(B, 2), sub), _round_up(B, sub))

    num_tiles = pl.cdiv(B, tm)

    # Keep the scoped VMEM limit above the double-buffered working set (covers
    # the minimum-tm fallback at large K, up to near-physical VMEM).
    need = 2 * tm * row_bytes + 2 * tm * 4 + (1 << 20)
    vmem_limit = max(vmem_limit, min(need, 120 * 1024 * 1024))
    # TODO(synk): for vocab-scale K (f32 K >~ 512K) add an inner "arbitrary"
    # K grid axis with VMEM scratch for running m / exp-sum / sum-x / x_at_t
    # (init/finalize via pl.when) so VMEM stays bounded independent of K.

    # In-kernel K chunking for the fused single-sweep reduction.
    chunk = min(K, 512)
    num_full = K // chunk
    rem = K - num_full * chunk
    unroll = num_full <= 8

    kernel = functools.partial(
        _ce_label_smooth_kernel,
        epsilon=float(epsilon), num_classes=K, batch=B, block_rows=tm,
        chunk=chunk, num_full_chunks=num_full, rem=rem, unroll=unroll)

    cost = pl.CostEstimate(
        flops=6 * B * K,
        transcendentals=B * K,
        bytes_accessed=B * K * itemsize + B * 4 + num_tiles * 4)

    partial_sums = pl.pallas_call(
        kernel,
        out_shape=jax.ShapeDtypeStruct((num_tiles, 1, 1), jnp.float32),
        grid=(num_tiles,),
        in_specs=[
            pl.BlockSpec((tm, K), lambda i: (i, 0)),   # logits tile (native dtype)
            pl.BlockSpec((tm, 1), lambda i: (i, 0)),   # labels tile
        ],
        out_specs=pl.BlockSpec((1, 1, 1), lambda i: (i, 0, 0)),
        compiler_params=pltpu.CompilerParams(
            dimension_semantics=("parallel",),         # shard batch tiles across TCs
            vmem_limit_bytes=int(vmem_limit)),
        cost_estimate=cost,
    )(inputs, targets2d)

    inv_b = 1.0 / float(B)                             # precomputed, no per-call divide
    return jnp.sum(partial_sums) * jnp.float32(inv_b)


def _reference(inputs, targets, epsilon=0.1):
    """Pure-JAX reference mirroring the PyTorch forward."""
    B, K = inputs.shape
    log_probs = jax.nn.log_softmax(inputs.astype(jnp.float32), axis=1)
    onehot = jax.nn.one_hot(targets, K, dtype=jnp.float32)
    t = (1.0 - epsilon) * onehot + epsilon / K
    return jnp.sum(jnp.mean(-t * log_probs, axis=0))


if __name__ == "__main__":
    key = jax.random.PRNGKey(0)

    # Case 1: small, single tile, single chunk (batch=8, num_classes=32).
    B, K = 8, 32
    k_x, k_t, key = jax.random.split(key, 3)
    logits = jax.random.normal(k_x, (B, K), dtype=jnp.float32)
    labels = jax.random.randint(k_t, (B,), 0, K, dtype=jnp.int32)
    loss = jax.block_until_ready(cross_entropy_label_smooth(logits, labels,
                                                            epsilon=0.1))
    ref = _reference(logits, labels, epsilon=0.1)
    assert jnp.allclose(loss, ref, atol=1e-5, rtol=1e-5), (loss, ref)

    # Case 2: exercises multi-tile grid, padded last tile and remainder chunk
    # (batch=21 -> 2 tiles of 16 rows, num_classes=640 -> 512 + 128 chunks).
    B2, K2 = 21, 640
    k_x2, k_t2, key = jax.random.split(key, 3)
    logits2 = jax.random.normal(k_x2, (B2, K2), dtype=jnp.float32)
    labels2 = jax.random.randint(k_t2, (B2,), 0, K2, dtype=jnp.int32)
    loss2 = jax.block_until_ready(cross_entropy_label_smooth(logits2, labels2,
                                                             epsilon=0.1))
    ref2 = _reference(logits2, labels2, epsilon=0.1)
    assert jnp.allclose(loss2, ref2, atol=1e-4, rtol=1e-5), (loss2, ref2)

    print("KERNEL_OK")
</pallas_src>

<mosaic_0001>
module attributes {stable_mosaic.version = 11 : i64} {
  func.func @_ce_label_smooth_kernel(%arg0: i32, %arg1: memref<8x32xf32, #tpu.memory_space<vmem>>, %arg2: memref<8x1xi32, #tpu.memory_space<vmem>>, %arg3: memref<1x1x1xf32, #tpu.memory_space<vmem>>) attributes {dimension_semantics = [#tpu.dimension_semantics<parallel>], iteration_bounds = array<i64: 1>, scalar_prefetch = 0 : i64, scratch_operands = 0 : i64, tpu.core_type = #tpu.core_type<tc>, window_params = [{transform_indices = @transform_0, window_bounds = array<i64: 8, 32>}, {transform_indices = @transform_1, window_bounds = array<i64: 8, 1>}, {transform_indices = @transform_2, window_bounds = array<i64: 1, 1, 1>}]} {
    %c0 = arith.constant 0 : index
    %c0_0 = arith.constant 0 : index
    %0 = vector.load %arg2[%c0, %c0_0] : memref<8x1xi32, #tpu.memory_space<vmem>>, vector<8x1xi32>
    %1 = tpu.iota {dimensions = array<i32: 1>} : vector<8x32xi32>
    %cst = arith.constant 0xFF800000 : f32
    %2 = vector.broadcast %cst : f32 to vector<8x1xf32>
    %cst_1 = arith.constant 0.000000e+00 : f32
    %3 = vector.broadcast %cst_1 : f32 to vector<8x1xf32>
    %cst_2 = arith.constant 0.000000e+00 : f32
    %4 = vector.broadcast %cst_2 : f32 to vector<8x1xf32>
    %cst_3 = arith.constant 0.000000e+00 : f32
    %5 = vector.broadcast %cst_3 : f32 to vector<8x1xf32>
    %c0_4 = arith.constant 0 : index
    %c0_5 = arith.constant 0 : index
    %6 = vector.load %arg1[%c0_4, %c0_5] : memref<8x32xf32, #tpu.memory_space<vmem>>, vector<8x32xf32>
    %cst_6 = arith.constant dense<0xFF800000> : vector<8xf32>
    %7 = vector.multi_reduction <maximumf>, %6, %cst_6 [1] : vector<8x32xf32> to vector<8xf32>
    %8 = vector.shape_cast %7 : vector<8xf32> to vector<8x1xf32>
    %9 = arith.maximumf %2, %8 : vector<8x1xf32>
    %10 = arith.subf %2, %9 : vector<8x1xf32>
    %11 = math.exp %10 : vector<8x1xf32>
    %12 = arith.mulf %3, %11 : vector<8x1xf32>
    %13 = vector.broadcast %9 : vector<8x1xf32> to vector<8x32xf32>
    %14 = arith.subf %6, %13 : vector<8x32xf32>
    %15 = math.exp %14 : vector<8x32xf32>
    %cst_7 = arith.constant dense<0.000000e+00> : vector<8xf32>
    %16 = vector.multi_reduction <add>, %15, %cst_7 [1] : vector<8x32xf32> to vector<8xf32>
    %17 = vector.shape_cast %16 : vector<8xf32> to vector<8x1xf32>
    %18 = arith.addf %12, %17 : vector<8x1xf32>
    %cst_8 = arith.constant dense<0.000000e+00> : vector<8xf32>
    %19 = vector.multi_reduction <add>, %6, %cst_8 [1] : vector<8x32xf32> to vector<8xf32>
    %20 = vector.shape_cast %19 : vector<8xf32> to vector<8x1xf32>
    %21 = arith.addf %4, %20 : vector<8x1xf32>
    %c0_i32 = arith.constant 0 : i32
    %22 = vector.broadcast %c0_i32 : i32 to vector<8x1xi32>
    %23 = arith.subi %0, %22 : vector<8x1xi32>
    %24 = vector.broadcast %23 : vector<8x1xi32> to vector<8x32xi32>
    %25 = arith.cmpi eq, %1, %24 : vector<8x32xi32>
    %cst_9 = arith.constant 0.000000e+00 : f32
    %26 = vector.broadcast %cst_9 : f32 to vector<8x32xf32>
    %27 = arith.select %25, %6, %26 : vector<8x32xi1>, vector<8x32xf32>
    %cst_10 = arith.constant dense<0.000000e+00> : vector<8xf32>
    %28 = vector.multi_reduction <add>, %27, %cst_10 [1] : vector<8x32xf32> to vector<8xf32>
    %29 = vector.shape_cast %28 : vector<8xf32> to vector<8x1xf32>
    %30 = arith.addf %5, %29 : vector<8x1xf32>
    %31 = math.log %18 : vector<8x1xf32>
    %32 = arith.addf %9, %31 : vector<8x1xf32>
    %cst_11 = arith.constant 0.899999976 : f32
    %33 = vector.broadcast %cst_11 : f32 to vector<8x1xf32>
    %34 = arith.mulf %33, %30 : vector<8x1xf32>
    %35 = arith.subf %32, %34 : vector<8x1xf32>
    %cst_12 = arith.constant 3.125000e-03 : f32
    %36 = vector.broadcast %cst_12 : f32 to vector<8x1xf32>
    %37 = arith.mulf %36, %21 : vector<8x1xf32>
    %38 = arith.subf %35, %37 : vector<8x1xf32>
    %39 = vector.shape_cast %38 : vector<8x1xf32> to vector<1x8x1xf32>
    %cst_13 = arith.constant dense<0.000000e+00> : vector<1xf32>
    %40 = vector.multi_reduction <add>, %39, %cst_13 [1, 2] : vector<1x8x1xf32> to vector<1xf32>
    %41 = vector.shape_cast %40 : vector<1xf32> to vector<1x1x1xf32>
    %42 = vector.extract %41[0, 0, 0] : f32 from vector<1x1x1xf32>
    %43 = vector.broadcast %42 : f32 to vector<1x1x1xf32>
    %c0_14 = arith.constant 0 : index
    %c0_15 = arith.constant 0 : index
    %c0_16 = arith.constant 0 : index
    %44 = vector.load %arg3[%c0_14, %c0_15, %c0_16] : memref<1x1x1xf32, #tpu.memory_space<vmem>>, vector<1x1x1xf32>
    tpu.vector_store %arg3[%c0_14, %c0_15, %c0_16], %43 {strides = array<i32>} : memref<1x1x1xf32, #tpu.memory_space<vmem>>, vector<1x1x1xf32>,
    return
  }
  func.func @transform_0(%arg0: i32) -> (i32, i32) {
    %c0_i32 = arith.constant 0 : i32
    %c0_i32_0 = arith.constant 0 : i32
    return %arg0, %c0_i32 : i32, i32
  }
  func.func @transform_1(%arg0: i32) -> (i32, i32) {
    %c0_i32 = arith.constant 0 : i32
    %c0_i32_0 = arith.constant 0 : i32
    return %arg0, %c0_i32 : i32, i32
  }
  func.func @transform_2(%arg0: i32) -> (i32, i32, i32) {
    %c0_i32 = arith.constant 0 : i32
    %c0_i32_0 = arith.constant 0 : i32
    %c0_i32_1 = arith.constant 0 : i32
    return %arg0, %c0_i32, %c0_i32_0 : i32, i32, i32
  }
}

</mosaic_0001>

<bundles_post_ra>
// kernel: tpu_custom_call.1
= control target key start
LH: loop header
LB: loop body
LE: loop exit
PB: predicated region body
PF: predicated region fallthrough
CT: control target
= control target key end

     0   :  { %vm16_vm0 = vcmask 261120   ;;  %s148_s0 = inlined_call_operand.vmem [shape: f32[8,32], index: 0, kind: input, shape index: {}]   ;;  %s149_s1 = inlined_call_operand.vmem [shape: s32[8,1], index: 1, kind: input, shape index: {}]   ;;  %s150_s2 = inlined_call_operand.hbm [shape: f32[1,1,1], index: 2, kind: output, shape index: {}]  }
   0x1   :  { %v15_v0 = vld [vmem:[%s148_s0] sm:$0xff] }
   0x2   :  { %7 = vsyncpa [#allocation3], 0  ;;  %v17_v1 = vsel %vm16_vm0, %v15_v0, -inf  ;;  %v118_v2 = vmov 0   ;;  %v12_v3 = vld [vmem:[%s149_s1] sm:$0xff]  ;;  %v31_v4 = vsel %vm16_vm0, %v15_v0, 0.0  ;;  %v13_v10 = vlaneseq }
   0x3   :  { %85 = vset.pattern.permute.xlu0 %v118_v2  ;;  %32 = vadd.xlane.f32.xlu2 %v31_v4  ;;  %vm51_vm2 = vcmask 7168   ;;  %s119_s0 = smov [#allocation2]   ;;  %s72_s15 = sshll.u32 %s150_s2, 4  ;;  %vm63_vm3 = vcmask 0   ;;  %s73_s15 = int_to_ptr.hbm [resolvable:$true] %s72_s15 }
   0x4   :  { %18 = vmax.xlane.f32.xlu0 %v17_v1  ;;  %v14_v11 = vand.u32 127, %v13_v10  ;;  %s70_s1 = sshll.u32 %s119_s0, 4  ;;  %s71_s1 = int_to_ptr.vmem [resolvable:$true] %s70_s1 }
  0x18   :  { %36 = vperm.xlu0 %85, %v12_v3  }
  0x76   :  { %v33_v22 = vpop.xlane.xlu2 %32 }
  0x77   :  { %v19_v5 = vpop.xlane.xlu0 %18  ;;  %v49_v27 = vmul.f32 0.003125, %v33_v22 }
  0x78   :  { %v24_v6 = vsub.f32 %v15_v0, %v19_v5  ;;  %v20_v15 = vsub.f32 -inf, %v19_v5 }
  0x7a   :  { %v25_v7 = vmul.f32 1.442695, %v24_v6  ;;  %v21_v16 = vmul.f32 1.442695, %v20_v15 }
  0x7c   :  { %86 = vpow2.f32 %v25_v7 }
  0x7d   :  { %88 = vpow2.f32 %v21_v16 }
  0x82   :  { %v87_v8 = vpop.eup %86 }
  0x83   :  { %v27_v9 = vsel %vm16_vm0, %v87_v8, 0.0  ;;  %v89_v17 = vpop.eup %88 }
  0x84   :  { %28 = vadd.xlane.f32.xlu1 %v27_v9  ;;  %v23_v18 = vmul.f32 0.0, %v89_v17 }
  0x8a   :  { %v37_v12 = vpop.permute.xlu0 %36 }
  0x8b   :  { %vm38_vm1 = vcmp.eq.s32.totalorder %v14_v11, %v37_v12 }
  0x8c   :  { %v39_v13 = vsel %vm38_vm1, %v15_v0, 0.0 }
  0x8d   :  { %v40_v14 = vsel %vm16_vm0, %v39_v13, 0.0 }
  0x8e   :  { %41 = vadd.xlane.f32.xlu1 %v40_v14 }
  0xf7   :  { %v29_v19 = vpop.xlane.xlu1 %28 }
  0xf8   :  { %v30_v20 = vadd.f32 %v29_v19, %v23_v18 }
  0xfa   :  { %90 = vlog2.f32 %v30_v20 }
 0x100   :  { %v91_v21 = vpop.eup %90 }
 0x101   :  { %v45_v23 = vmul.f32 0.6931472, %v91_v21  ;;  %v42_v24 = vpop.xlane.xlu1 %41 }
 0x102   :  { %v47_v25 = vmul.f32 0.9, %v42_v24 }
 0x103   :  { %v46_v26 = vadd.f32 %v45_v23, %v19_v5 }
 0x105   :  { %v48_v28 = vsub.f32 %v46_v26, %v47_v25 }
 0x107   :  { %v50_v29 = vsub.f32 %v48_v28, %v49_v27 }
 0x109   :  { %v52_v30 = vsel %vm51_vm2, %v50_v29, 0.0 }
 0x10a   :  { %53 = vadd.xlane.f32.xlu2 %v52_v30 }
 0x17d   :  { %v54_v31 = vpop.xlane.xlu2 %53 }
 0x17e   :  { %v55_v32 = vrot.slane %v54_v31, 4 }
 0x180   :  { %v56_v33 = vadd.f32 %v55_v32, %v54_v31 }
 0x182   :  { %v57_v34 = vrot.slane %v56_v33, 2 }
 0x184   :  { %v58_v35 = vadd.f32 %v57_v34, %v56_v33 }
 0x186   :  { %v59_v36 = vrot.slane %v58_v35, 1 }
 0x188   :  { %v60_v37 = vadd.f32 %v59_v36, %v58_v35 }
 0x18a   :  { %81 = vpush %v60_v37 }
 0x1bb   :  { %s82_s16 = spop %81 }
 0x1bc   :  { %v62_v38 = vstv %s82_s16 }
 0x1bd   :  { %64 = vst.msk [vmem:[#allocation2] sm:$0x1] %vm63_vm3, %v62_v38 }
 0x1be   :  { %75 = dma.vmem_to_hbm [thread:$0]  %s71_s1, 16, %s73_s15, [#allocation3]  }
 0x1bf   :  { %116 = dma.done.wait [#allocation3], 16  }
 0x1c0   :  { %117 = vsyncadd [#allocation3], 4294967280 }
 0x1c1   :  { %80 = vsyncpa [#allocation3], 1 }

</bundles_post_ra>
